<compile_context>
chip_gen: v7x
topology: tpu7x:2x2x1
jax: 0.10.0
libtpu: 0.0.40
codegen_flags: <defaults>
</compile_context>

<pallas_src>
import math
from functools import partial

import jax
import jax.numpy as jnp
from jax.experimental import pallas as pl
from jax.experimental.pallas import tpu as pltpu

# ---- module hyper-parameters (ScoreModel defaults) ----
D = 2                  # position DOF
N_TIME_DESC = 5        # time descriptors
WIDTH_SCALE = 10
N_RESNET = 8
OUTPUT_SCALE = 8.0
INPUT_MEAN = 0.0
INPUT_STD = 1.0
HIDDEN = WIDTH_SCALE * (D + N_TIME_DESC)   # 70
HP = 128                                   # lane-padded hidden width
N_IN = D + N_TIME_DESC                     # 7 input-Linear rows
N_IN_COLS = D + 2                          # packed input columns: x0,x1,t,sin
IN_PAD = 8                                 # packed input lane width

FEATS_DTYPE = jnp.bfloat16   # per-layer feature dump dtype (halves HBM writes)


def _round_up(a: int, b: int) -> int:
    return ((a + b - 1) // b) * b


def time_descriptor(t: jnp.ndarray, n: int) -> jnp.ndarray:
    """t: (M,) in [0,1] -> (M, n) descriptors (matches the torch version)."""
    assert t.ndim == 1
    tc = t[:, None]
    emb = jnp.concatenate(
        [
            tc,
            jnp.exp(-tc * 3.0),
            jnp.exp(-tc * 12.0),
            jnp.sin(jnp.exp(-tc * 6.0) * math.pi),
            jnp.exp(-tc * 6.0),
        ],
        axis=1,
    )
    return emb[:, :n]


# ---------------------------------------------------------------------------
# Kernel body (shared between the feature-capturing and inference variants).
# ---------------------------------------------------------------------------
def _forward_body(inp_ref, w_in_ref, b_in_ref, w_res_ref, b_res_ref,
                  w_out_ref, b_out_ref, feats_ref, *, tanh_in_bf16):
    """Full MLP for one (bm, ...) row block; returns pre-scale (bm, D) f32."""
    f32 = jnp.float32
    bf16 = jnp.bfloat16

    inp = inp_ref[...].astype(f32)                      # (bm, 8) packed stream
    t = inp[:, D:D + 1]                                 # (bm, 1)

    # Input Linear as broadcast-MACs on the VPU (no mostly-empty K=7 MXU pass).
    # Standardization is folded into w_in/b_in; exp() uses the EUP slot; the
    # sin(exp(-6t)*pi) column is precomputed in the wrapper.
    cols = (
        inp[:, 0:1],                # x0
        inp[:, 1:2],                # x1
        t,                          # descriptor 0
        jnp.exp(t * (-3.0)),        # descriptor 1
        jnp.exp(t * (-12.0)),       # descriptor 2
        inp[:, D + 1:D + 2],        # descriptor 3: sin(exp(-6t)*pi) (wrapper)
        jnp.exp(t * (-6.0)),        # descriptor 4
    )[:N_IN]
    h = b_in_ref[...] + cols[0] * w_in_ref[0:1, :]      # (bm, HP); lanes>=HIDDEN are 0
    for k in range(1, N_IN):
        h = h + cols[k] * w_in_ref[k:k + 1, :]

    h_bf = h.astype(bf16)           # single f32->bf16 pack, reused for MXU + feats
    if feats_ref is not None:
        feats_ref[0] = h_bf.astype(feats_ref.dtype)

    # TODO(synk): ResNetModule is not defined in the provided source; assumed
    #             the standard width-preserving form  h = h + tanh(Linear(h)).
    for i in range(N_RESNET):
        z = jnp.dot(h_bf, w_res_ref[i], preferred_element_type=f32) + b_res_ref[i]
        if tanh_in_bf16:
            a = jnp.tanh(z.astype(bf16)).astype(f32)    # halves EUP work (v6e/v7x)
        else:
            a = jnp.tanh(z)                             # v5e: no bf16 EUP path
        h = h + a                                       # residual chain stays f32
        h_bf = h.astype(bf16)
        if feats_ref is not None:
            feats_ref[i + 1] = h_bf.astype(feats_ref.dtype)

    # Last Linear (pre-scale; *OUTPUT_SCALE applied in the wrapper).
    return jnp.dot(h_bf, w_out_ref[...], preferred_element_type=f32) + b_out_ref[...]


def score_kernel_feats(inp_ref, w_in_ref, b_in_ref, w_res_ref, b_res_ref,
                       w_out_ref, b_out_ref, y_ref, feats_ref, *, tanh_in_bf16):
    y_ref[...] = _forward_body(inp_ref, w_in_ref, b_in_ref, w_res_ref,
                               b_res_ref, w_out_ref, b_out_ref, feats_ref,
                               tanh_in_bf16=tanh_in_bf16)


def score_kernel_nofeats(inp_ref, w_in_ref, b_in_ref, w_res_ref, b_res_ref,
                         w_out_ref, b_out_ref, y_ref, *, tanh_in_bf16):
    y_ref[...] = _forward_body(inp_ref, w_in_ref, b_in_ref, w_res_ref,
                               b_res_ref, w_out_ref, b_out_ref, None,
                               tanh_in_bf16=tanh_in_bf16)


# ---------------------------------------------------------------------------
# Wrapper: padding, BlockSpecs/grid, pallas_call, output scaling.
# ---------------------------------------------------------------------------
def score_model_forward(x, t, params, *, capture_features=True, block_m=2048,
                        tanh_in_bf16=True):
    """x: (M, D) f32, t: (M,) f32 in [0,1].

    Returns (out (M, D), layer_features dict) matching ScoreModel.forward.
    With capture_features=False, layer_features is None (inference fast path).
    Set tanh_in_bf16=False on v5e (no bf16 EUP path).
    """
    M = x.shape[0]

    # Row-block size: multiple of 8 sublanes.  Whole batch in one block if it
    # fits under block_m; otherwise aim for >=4 grid steps (keeps both v7x
    # TensorCores busy under dimension_semantics=("parallel",)).
    blk = _round_up(block_m, 8)
    m8 = _round_up(max(M, 1), 8)
    if m8 <= blk:
        bm = m8
    else:
        bm = min(blk, max(512, _round_up(-(-M // 4), 8)))
    m_pad = _round_up(M, bm)
    grid = (m_pad // bm,)

    # --- packed input: [x0, x1, t, sin(exp(-6t)*pi), 0,0,0,0] as ONE (M, 8)
    # f32 stream.  The remaining exp() descriptors are computed in-kernel.
    x_f = x.astype(jnp.float32)
    t_f = t.astype(jnp.float32).reshape(M, 1)
    sin_col = jnp.sin(jnp.exp(t_f * (-6.0)) * math.pi)
    inp = jnp.concatenate([x_f, t_f, sin_col], axis=1)              # (M, 4)
    inp = jnp.pad(inp, ((0, m_pad - M), (0, IN_PAD - N_IN_COLS)))   # (m_pad, 8)

    # --- weights: fold input standardization into w_in/b_in, zero-pad the
    # hidden width 70 -> 128 lanes.  Padded lanes stay exactly zero.
    w_in_f = params["w_in"].astype(jnp.float32)        # (N_IN, HIDDEN)
    b_in_f = params["b_in"].astype(jnp.float32)        # (1, HIDDEN)
    w_x = w_in_f[:D] / INPUT_STD
    b_eff = b_in_f - (INPUT_MEAN / INPUT_STD) * jnp.sum(w_in_f[:D], axis=0,
                                                        keepdims=True)
    w_in_p = jnp.pad(jnp.concatenate([w_x, w_in_f[D:]], axis=0),
                     ((0, 8 - N_IN), (0, HP - HIDDEN)))             # (8, 128) f32
    b_in_p = jnp.pad(b_eff, ((0, 0), (0, HP - HIDDEN)))             # (1, 128) f32
    w_res_p = jnp.pad(params["w_res"].astype(jnp.float32),
                      ((0, 0), (0, HP - HIDDEN), (0, HP - HIDDEN))
                      ).astype(jnp.bfloat16)                        # (8,128,128)
    b_res_p = jnp.pad(params["b_res"].astype(jnp.float32),
                      ((0, 0), (0, 0), (0, HP - HIDDEN)))           # (8,1,128)
    w_out_p = jnp.pad(params["w_out"].astype(jnp.float32),
                      ((0, HP - HIDDEN), (0, 0))).astype(jnp.bfloat16)  # (128, D)
    b_out_p = params["b_out"].astype(jnp.float32)                   # (1, D)

    in_specs = [
        pl.BlockSpec((bm, IN_PAD), lambda i: (i, 0)),               # packed inputs
        pl.BlockSpec((8, HP), lambda i: (0, 0)),                    # w_in  (resident)
        pl.BlockSpec((1, HP), lambda i: (0, 0)),                    # b_in
        pl.BlockSpec((N_RESNET, HP, HP), lambda i: (0, 0, 0)),      # w_res (bf16)
        pl.BlockSpec((N_RESNET, 1, HP), lambda i: (0, 0, 0)),       # b_res
        pl.BlockSpec((HP, D), lambda i: (0, 0)),                    # w_out (bf16)
        pl.BlockSpec((1, D), lambda i: (0, 0)),                     # b_out
    ]
    y_shape = jax.ShapeDtypeStruct((m_pad, D), jnp.float32)
    y_spec = pl.BlockSpec((bm, D), lambda i: (i, 0))

    feat_item = jnp.dtype(FEATS_DTYPE).itemsize
    weight_bytes = (w_in_p.size + b_in_p.size + b_res_p.size + b_out_p.size) * 4 \
        + (w_res_p.size + w_out_p.size) * 2
    feat_bytes = ((N_RESNET + 1) * m_pad * HP * feat_item
                  if capture_features else 0)
    io_bytes = m_pad * (IN_PAD * 4 + D * 4) + weight_bytes + feat_bytes
    flops = 2 * m_pad * (N_IN * HP + N_RESNET * HP * HP + HP * D)
    cost = pl.CostEstimate(flops=flops,
                           transcendentals=m_pad * (N_RESNET * HIDDEN + 3),
                           bytes_accessed=io_bytes)

    # VMEM budget: double-buffered streams + resident weights + f32/bf16
    # intermediates; cap at 48 MiB (headroom under v7x's 64 MiB physical).
    per_step_bytes = bm * IN_PAD * 4 + bm * D * 4 \
        + (bm * (N_RESNET + 1) * HP * feat_item if capture_features else 0)
    interm_bytes = bm * HP * (4 + 4 + 2)       # h, z, h_bf live copies (approx)
    vmem_limit = int(min(48 << 20,
                         max(32 << 20,
                             2 * (per_step_bytes + weight_bytes)
                             + 4 * interm_bytes + (8 << 20))))

    compiler_params = pltpu.CompilerParams(
        dimension_semantics=("parallel",),     # rows independent (2 TCs on v7x)
        vmem_limit_bytes=vmem_limit,
    )
    args = (inp, w_in_p, b_in_p, w_res_p, b_res_p, w_out_p, b_out_p)

    if capture_features:
        # TODO(synk): on v5e (HBM-write-bound) a transposed (layers, HP, bm)
        #             feature dump would avoid the padded write bytes.
        out_shape = (
            y_shape,
            jax.ShapeDtypeStruct((N_RESNET + 1, m_pad, HP), FEATS_DTYPE),
        )
        out_specs = (
            y_spec,
            pl.BlockSpec((N_RESNET + 1, bm, HP), lambda i: (0, i, 0)),
        )
        y, feats = pl.pallas_call(
            partial(score_kernel_feats, tanh_in_bf16=tanh_in_bf16),
            out_shape=out_shape,
            grid=grid,
            in_specs=in_specs,
            out_specs=out_specs,
            compiler_params=compiler_params,
            cost_estimate=cost,
        )(*args)
        y = y[:M]
        feats = feats[:, :M, :HIDDEN]
        layer_features = {i: feats[i] for i in range(N_RESNET + 1)}
        layer_features[N_RESNET + 1] = y       # pre-scale last-layer feature
        return y * OUTPUT_SCALE, layer_features

    y = pl.pallas_call(
        partial(score_kernel_nofeats, tanh_in_bf16=tanh_in_bf16),
        out_shape=y_shape,
        grid=grid,
        in_specs=in_specs,
        out_specs=y_spec,
        compiler_params=compiler_params,
        cost_estimate=cost,
    )(*args)[:M]
    return y * OUTPUT_SCALE, None


# ---------------------------------------------------------------------------
# Deterministic parameter init (PyTorch nn.Linear style: U(-1/sqrt(fan_in), .)).
# Weights stored as (fan_in, fan_out).
# ---------------------------------------------------------------------------
def init_params(key):
    def linear_init(k, fan_in, fan_out):
        k1, k2 = jax.random.split(k)
        bound = 1.0 / math.sqrt(fan_in)
        w = jax.random.uniform(k1, (fan_in, fan_out), jnp.float32, -bound, bound)
        b = jax.random.uniform(k2, (1, fan_out), jnp.float32, -bound, bound)
        return w, b

    keys = jax.random.split(key, N_RESNET + 2)
    w_in, b_in = linear_init(keys[0], D + N_TIME_DESC, HIDDEN)
    w_res_l, b_res_l = [], []
    for i in range(N_RESNET):
        w, b = linear_init(keys[1 + i], HIDDEN, HIDDEN)
        w_res_l.append(w)
        b_res_l.append(b)
    w_out, b_out = linear_init(keys[-1], HIDDEN, D)
    return dict(
        w_in=w_in, b_in=b_in,
        w_res=jnp.stack(w_res_l), b_res=jnp.stack(b_res_l),
        w_out=w_out, b_out=b_out,
    )


# ---------------------------------------------------------------------------
# Pure-JAX f32 reference (mirrors the PyTorch forward) for verification.
# ---------------------------------------------------------------------------
def reference_forward(x, t, params):
    t_desc = time_descriptor(t, N_TIME_DESC)
    h = jnp.concatenate([(x - INPUT_MEAN) / INPUT_STD, t_desc], axis=1)
    feats = {}
    h = h @ params["w_in"] + params["b_in"]
    feats[0] = h
    for i in range(N_RESNET):
        # TODO(synk): same ResNetModule assumption as the kernel (see above).
        h = h + jnp.tanh(h @ params["w_res"][i] + params["b_res"][i])
        feats[i + 1] = h
    h = h @ params["w_out"] + params["b_out"]
    feats[N_RESNET + 1] = h
    return h * OUTPUT_SCALE, feats


def _rel_err(a, b):
    a = jnp.asarray(a, jnp.float32)
    b = jnp.asarray(b, jnp.float32)
    return float(jnp.linalg.norm(a - b) / (jnp.linalg.norm(b) + 1e-12))


if __name__ == "__main__":
    key = jax.random.PRNGKey(0)
    kx, kt, kp = jax.random.split(key, 3)

    M = 12                                   # not a multiple of 8 -> exercises padding
    x = jax.random.normal(kx, (M, D), dtype=jnp.float32)
    t = jax.random.uniform(kt, (M,), dtype=jnp.float32)
    params = init_params(kp)

    fwd = jax.jit(score_model_forward,
                  static_argnames=("capture_features", "block_m", "tanh_in_bf16"))

    out, layer_features = fwd(x, t, params)
    out = jax.block_until_ready(out)

    out_ref, feats_ref_d = reference_forward(x, t, params)

    assert out.shape == (M, D)
    assert set(layer_features.keys()) == set(range(N_RESNET + 2))
    for i in range(N_RESNET + 1):
        assert layer_features[i].shape == (M, HIDDEN)

    # bf16 MXU inputs / bf16 tanh (f32 residual + accumulation) + bf16 feature
    # storage -> loose tolerance vs the pure-f32 reference.
    TOL = 3e-2
    assert _rel_err(out, out_ref) < TOL, ("out", _rel_err(out, out_ref))
    for i in range(N_RESNET + 2):
        e = _rel_err(layer_features[i], feats_ref_d[i])
        assert e < TOL, (i, e)

    # Inference fast path (no feature capture) must match the main path.
    out_nf, feats_nf = fwd(x, t, params, capture_features=False)
    out_nf = jax.block_until_ready(out_nf)
    assert feats_nf is None
    assert jnp.allclose(out_nf, out, atol=1e-4, rtol=1e-4)

    # Multi-step grid + row padding path (exercises streamed row blocks).
    M2 = 20
    x2 = jax.random.normal(kx, (M2, D), dtype=jnp.float32)
    t2 = jax.random.uniform(kt, (M2,), dtype=jnp.float32)
    out2, feats2 = fwd(x2, t2, params, block_m=8)
    out2 = jax.block_until_ready(out2)
    out2_ref, feats2_ref = reference_forward(x2, t2, params)
    assert _rel_err(out2, out2_ref) < TOL
    for i in range(N_RESNET + 2):
        assert _rel_err(feats2[i], feats2_ref[i]) < TOL, i

    print("KERNEL_OK")
</pallas_src>

<mosaic_0001>
module attributes {stable_mosaic.version = 11 : i64} {
  func.func @score_kernel_feats(%arg0: i32, %arg1: memref<16x8xf32, #tpu.memory_space<vmem>>, %arg2: memref<8x128xf32, #tpu.memory_space<vmem>>, %arg3: memref<1x128xf32, #tpu.memory_space<vmem>>, %arg4: memref<8x128x128xbf16, #tpu.memory_space<vmem>>, %arg5: memref<8x1x128xf32, #tpu.memory_space<vmem>>, %arg6: memref<128x2xbf16, #tpu.memory_space<vmem>>, %arg7: memref<1x2xf32, #tpu.memory_space<vmem>>, %arg8: memref<16x2xf32, #tpu.memory_space<vmem>>, %arg9: memref<9x16x128xbf16, #tpu.memory_space<vmem>>) attributes {dimension_semantics = [#tpu.dimension_semantics<parallel>], iteration_bounds = array<i64: 1>, scalar_prefetch = 0 : i64, scratch_operands = 0 : i64, tpu.core_type = #tpu.core_type<tc>, window_params = [{transform_indices = @transform_0, window_bounds = array<i64: 16, 8>}, {pipeline_mode = #tpu.pipeline_mode<synchronous>, transform_indices = @transform_1, window_bounds = array<i64: 8, 128>}, {pipeline_mode = #tpu.pipeline_mode<synchronous>, transform_indices = @transform_2, window_bounds = array<i64: 1, 128>}, {pipeline_mode = #tpu.pipeline_mode<synchronous>, transform_indices = @transform_3, window_bounds = array<i64: 8, 128, 128>}, {pipeline_mode = #tpu.pipeline_mode<synchronous>, transform_indices = @transform_4, window_bounds = array<i64: 8, 1, 128>}, {pipeline_mode = #tpu.pipeline_mode<synchronous>, transform_indices = @transform_5, window_bounds = array<i64: 128, 2>}, {pipeline_mode = #tpu.pipeline_mode<synchronous>, transform_indices = @transform_6, window_bounds = array<i64: 1, 2>}, {transform_indices = @transform_7, window_bounds = array<i64: 16, 2>}, {transform_indices = @transform_8, window_bounds = array<i64: 9, 16, 128>}]} {
    %c0 = arith.constant 0 : index
    %c0_0 = arith.constant 0 : index
    %0 = vector.load %arg1[%c0, %c0_0] : memref<16x8xf32, #tpu.memory_space<vmem>>, vector<16x8xf32>
    %1 = vector.extract_strided_slice %0 {offsets = [0, 2], sizes = [16, 1], strides = [1, 1]} : vector<16x8xf32> to vector<16x1xf32>
    %2 = vector.extract_strided_slice %0 {offsets = [0, 0], sizes = [16, 1], strides = [1, 1]} : vector<16x8xf32> to vector<16x1xf32>
    %3 = vector.extract_strided_slice %0 {offsets = [0, 1], sizes = [16, 1], strides = [1, 1]} : vector<16x8xf32> to vector<16x1xf32>
    %cst = arith.constant -3.000000e+00 : f32
    %4 = vector.broadcast %cst : f32 to vector<16x1xf32>
    %5 = arith.mulf %1, %4 : vector<16x1xf32>
    %6 = math.exp %5 : vector<16x1xf32>
    %cst_1 = arith.constant -1.200000e+01 : f32
    %7 = vector.broadcast %cst_1 : f32 to vector<16x1xf32>
    %8 = arith.mulf %1, %7 : vector<16x1xf32>
    %9 = math.exp %8 : vector<16x1xf32>
    %10 = vector.extract_strided_slice %0 {offsets = [0, 3], sizes = [16, 1], strides = [1, 1]} : vector<16x8xf32> to vector<16x1xf32>
    %cst_2 = arith.constant -6.000000e+00 : f32
    %11 = vector.broadcast %cst_2 : f32 to vector<16x1xf32>
    %12 = arith.mulf %1, %11 : vector<16x1xf32>
    %13 = math.exp %12 : vector<16x1xf32>
    %c0_3 = arith.constant 0 : index
    %c0_4 = arith.constant 0 : index
    %14 = vector.load %arg3[%c0_3, %c0_4] : memref<1x128xf32, #tpu.memory_space<vmem>>, vector<1x128xf32>
    %c0_5 = arith.constant 0 : index
    %c0_6 = arith.constant 0 : index
    %15 = vector.load %arg2[%c0_5, %c0_6] : memref<8x128xf32, #tpu.memory_space<vmem>>, vector<1x128xf32>
    %16 = vector.broadcast %2 : vector<16x1xf32> to vector<16x128xf32>
    %17 = vector.broadcast %15 : vector<1x128xf32> to vector<16x128xf32>
    %18 = arith.mulf %16, %17 : vector<16x128xf32>
    %19 = vector.broadcast %14 : vector<1x128xf32> to vector<16x128xf32>
    %20 = arith.addf %19, %18 : vector<16x128xf32>
    %c1 = arith.constant 1 : index
    %c0_7 = arith.constant 0 : index
    %21 = vector.load %arg2[%c1, %c0_7] : memref<8x128xf32, #tpu.memory_space<vmem>>, vector<1x128xf32>
    %22 = vector.broadcast %3 : vector<16x1xf32> to vector<16x128xf32>
    %23 = vector.broadcast %21 : vector<1x128xf32> to vector<16x128xf32>
    %24 = arith.mulf %22, %23 : vector<16x128xf32>
    %25 = arith.addf %20, %24 : vector<16x128xf32>
    %c2 = arith.constant 2 : index
    %c0_8 = arith.constant 0 : index
    %26 = vector.load %arg2[%c2, %c0_8] : memref<8x128xf32, #tpu.memory_space<vmem>>, vector<1x128xf32>
    %27 = vector.broadcast %1 : vector<16x1xf32> to vector<16x128xf32>
    %28 = vector.broadcast %26 : vector<1x128xf32> to vector<16x128xf32>
    %29 = arith.mulf %27, %28 : vector<16x128xf32>
    %30 = arith.addf %25, %29 : vector<16x128xf32>
    %c3 = arith.constant 3 : index
    %c0_9 = arith.constant 0 : index
    %31 = vector.load %arg2[%c3, %c0_9] : memref<8x128xf32, #tpu.memory_space<vmem>>, vector<1x128xf32>
    %32 = vector.broadcast %6 : vector<16x1xf32> to vector<16x128xf32>
    %33 = vector.broadcast %31 : vector<1x128xf32> to vector<16x128xf32>
    %34 = arith.mulf %32, %33 : vector<16x128xf32>
    %35 = arith.addf %30, %34 : vector<16x128xf32>
    %c4 = arith.constant 4 : index
    %c0_10 = arith.constant 0 : index
    %36 = vector.load %arg2[%c4, %c0_10] : memref<8x128xf32, #tpu.memory_space<vmem>>, vector<1x128xf32>
    %37 = vector.broadcast %9 : vector<16x1xf32> to vector<16x128xf32>
    %38 = vector.broadcast %36 : vector<1x128xf32> to vector<16x128xf32>
    %39 = arith.mulf %37, %38 : vector<16x128xf32>
    %40 = arith.addf %35, %39 : vector<16x128xf32>
    %c5 = arith.constant 5 : index
    %c0_11 = arith.constant 0 : index
    %41 = vector.load %arg2[%c5, %c0_11] : memref<8x128xf32, #tpu.memory_space<vmem>>, vector<1x128xf32>
    %42 = vector.broadcast %10 : vector<16x1xf32> to vector<16x128xf32>
    %43 = vector.broadcast %41 : vector<1x128xf32> to vector<16x128xf32>
    %44 = arith.mulf %42, %43 : vector<16x128xf32>
    %45 = arith.addf %40, %44 : vector<16x128xf32>
    %c6 = arith.constant 6 : index
    %c0_12 = arith.constant 0 : index
    %46 = vector.load %arg2[%c6, %c0_12] : memref<8x128xf32, #tpu.memory_space<vmem>>, vector<1x128xf32>
    %47 = vector.broadcast %13 : vector<16x1xf32> to vector<16x128xf32>
    %48 = vector.broadcast %46 : vector<1x128xf32> to vector<16x128xf32>
    %49 = arith.mulf %47, %48 : vector<16x128xf32>
    %50 = arith.addf %45, %49 : vector<16x128xf32>
    %51 = arith.truncf %50 : vector<16x128xf32> to vector<16x128xbf16>
    %c0_13 = arith.constant 0 : index
    %c0_14 = arith.constant 0 : index
    %c0_15 = arith.constant 0 : index
    %52 = vector.load %arg9[%c0_13, %c0_14, %c0_15] : memref<9x16x128xbf16, #tpu.memory_space<vmem>>, vector<1x16x128xbf16>
    %53 = vector.shape_cast %52 : vector<1x16x128xbf16> to vector<16x128xbf16>
    %54 = vector.shape_cast %51 : vector<16x128xbf16> to vector<1x16x128xbf16>
    tpu.vector_store %arg9[%c0_13, %c0_14, %c0_15], %54 {strides = array<i32>} : memref<9x16x128xbf16, #tpu.memory_space<vmem>>, vector<1x16x128xbf16>,
    %c0_16 = arith.constant 0 : index
    %c0_17 = arith.constant 0 : index
    %c0_18 = arith.constant 0 : index
    %55 = vector.load %arg4[%c0_16, %c0_17, %c0_18] : memref<8x128x128xbf16, #tpu.memory_space<vmem>>, vector<1x128x128xbf16>
    %56 = vector.shape_cast %55 : vector<1x128x128xbf16> to vector<128x128xbf16>
    %cst_19 = arith.constant dense<0.000000e+00> : vector<16x128xf32>
    %57 = tpu.matmul %51, %56, %cst_19 {dimension_numbers = #tpu.dot_dimension_numbers<[1], [0], [0], [1], [0, 0, 1, 1], [], []>} : vector<16x128xbf16>, vector<128x128xbf16>, vector<16x128xf32> -> vector<16x128xf32>
    %c0_20 = arith.constant 0 : index
    %c0_21 = arith.constant 0 : index
    %c0_22 = arith.constant 0 : index
    %58 = vector.load %arg5[%c0_20, %c0_21, %c0_22] : memref<8x1x128xf32, #tpu.memory_space<vmem>>, vector<1x1x128xf32>
    %59 = vector.shape_cast %58 : vector<1x1x128xf32> to vector<1x128xf32>
    %60 = vector.broadcast %59 : vector<1x128xf32> to vector<16x128xf32>
    %61 = arith.addf %57, %60 : vector<16x128xf32>
    %62 = arith.truncf %61 : vector<16x128xf32> to vector<16x128xbf16>
    %63 = math.tanh %62 : vector<16x128xbf16>
    %64 = arith.extf %63 : vector<16x128xbf16> to vector<16x128xf32>
    %65 = arith.addf %50, %64 : vector<16x128xf32>
    %66 = arith.truncf %65 : vector<16x128xf32> to vector<16x128xbf16>
    %c1_23 = arith.constant 1 : index
    %c0_24 = arith.constant 0 : index
    %c0_25 = arith.constant 0 : index
    %67 = vector.load %arg9[%c1_23, %c0_24, %c0_25] : memref<9x16x128xbf16, #tpu.memory_space<vmem>>, vector<1x16x128xbf16>
    %68 = vector.shape_cast %67 : vector<1x16x128xbf16> to vector<16x128xbf16>
    %69 = vector.shape_cast %66 : vector<16x128xbf16> to vector<1x16x128xbf16>
    tpu.vector_store %arg9[%c1_23, %c0_24, %c0_25], %69 {strides = array<i32>} : memref<9x16x128xbf16, #tpu.memory_space<vmem>>, vector<1x16x128xbf16>,
    %c1_26 = arith.constant 1 : index
    %c0_27 = arith.constant 0 : index
    %c0_28 = arith.constant 0 : index
    %70 = vector.load %arg4[%c1_26, %c0_27, %c0_28] : memref<8x128x128xbf16, #tpu.memory_space<vmem>>, vector<1x128x128xbf16>
    %71 = vector.shape_cast %70 : vector<1x128x128xbf16> to vector<128x128xbf16>
    %cst_29 = arith.constant dense<0.000000e+00> : vector<16x128xf32>
    %72 = tpu.matmul %66, %71, %cst_29 {dimension_numbers = #tpu.dot_dimension_numbers<[1], [0], [0], [1], [0, 0, 1, 1], [], []>} : vector<16x128xbf16>, vector<128x128xbf16>, vector<16x128xf32> -> vector<16x128xf32>
    %c1_30 = arith.constant 1 : index
    %c0_31 = arith.constant 0 : index
    %c0_32 = arith.constant 0 : index
    %73 = vector.load %arg5[%c1_30, %c0_31, %c0_32] : memref<8x1x128xf32, #tpu.memory_space<vmem>>, vector<1x1x128xf32>
    %74 = vector.shape_cast %73 : vector<1x1x128xf32> to vector<1x128xf32>
    %75 = vector.broadcast %74 : vector<1x128xf32> to vector<16x128xf32>
    %76 = arith.addf %72, %75 : vector<16x128xf32>
    %77 = arith.truncf %76 : vector<16x128xf32> to vector<16x128xbf16>
    %78 = math.tanh %77 : vector<16x128xbf16>
    %79 = arith.extf %78 : vector<16x128xbf16> to vector<16x128xf32>
    %80 = arith.addf %65, %79 : vector<16x128xf32>
    %81 = arith.truncf %80 : vector<16x128xf32> to vector<16x128xbf16>
    %c2_33 = arith.constant 2 : index
    %c0_34 = arith.constant 0 : index
    %c0_35 = arith.constant 0 : index
    %82 = vector.load %arg9[%c2_33, %c0_34, %c0_35] : memref<9x16x128xbf16, #tpu.memory_space<vmem>>, vector<1x16x128xbf16>
    %83 = vector.shape_cast %82 : vector<1x16x128xbf16> to vector<16x128xbf16>
    %84 = vector.shape_cast %81 : vector<16x128xbf16> to vector<1x16x128xbf16>
    tpu.vector_store %arg9[%c2_33, %c0_34, %c0_35], %84 {strides = array<i32>} : memref<9x16x128xbf16, #tpu.memory_space<vmem>>, vector<1x16x128xbf16>,
    %c2_36 = arith.constant 2 : index
    %c0_37 = arith.constant 0 : index
    %c0_38 = arith.constant 0 : index
    %85 = vector.load %arg4[%c2_36, %c0_37, %c0_38] : memref<8x128x128xbf16, #tpu.memory_space<vmem>>, vector<1x128x128xbf16>
    %86 = vector.shape_cast %85 : vector<1x128x128xbf16> to vector<128x128xbf16>
    %cst_39 = arith.constant dense<0.000000e+00> : vector<16x128xf32>
    %87 = tpu.matmul %81, %86, %cst_39 {dimension_numbers = #tpu.dot_dimension_numbers<[1], [0], [0], [1], [0, 0, 1, 1], [], []>} : vector<16x128xbf16>, vector<128x128xbf16>, vector<16x128xf32> -> vector<16x128xf32>
    %c2_40 = arith.constant 2 : index
    %c0_41 = arith.constant 0 : index
    %c0_42 = arith.constant 0 : index
    %88 = vector.load %arg5[%c2_40, %c0_41, %c0_42] : memref<8x1x128xf32, #tpu.memory_space<vmem>>, vector<1x1x128xf32>
    %89 = vector.shape_cast %88 : vector<1x1x128xf32> to vector<1x128xf32>
    %90 = vector.broadcast %89 : vector<1x128xf32> to vector<16x128xf32>
    %91 = arith.addf %87, %90 : vector<16x128xf32>
    %92 = arith.truncf %91 : vector<16x128xf32> to vector<16x128xbf16>
    %93 = math.tanh %92 : vector<16x128xbf16>
    %94 = arith.extf %93 : vector<16x128xbf16> to vector<16x128xf32>
    %95 = arith.addf %80, %94 : vector<16x128xf32>
    %96 = arith.truncf %95 : vector<16x128xf32> to vector<16x128xbf16>
    %c3_43 = arith.constant 3 : index
    %c0_44 = arith.constant 0 : index
    %c0_45 = arith.constant 0 : index
    %97 = vector.load %arg9[%c3_43, %c0_44, %c0_45] : memref<9x16x128xbf16, #tpu.memory_space<vmem>>, vector<1x16x128xbf16>
    %98 = vector.shape_cast %97 : vector<1x16x128xbf16> to vector<16x128xbf16>
    %99 = vector.shape_cast %96 : vector<16x128xbf16> to vector<1x16x128xbf16>
    tpu.vector_store %arg9[%c3_43, %c0_44, %c0_45], %99 {strides = array<i32>} : memref<9x16x128xbf16, #tpu.memory_space<vmem>>, vector<1x16x128xbf16>,
    %c3_46 = arith.constant 3 : index
    %c0_47 = arith.constant 0 : index
    %c0_48 = arith.constant 0 : index
    %100 = vector.load %arg4[%c3_46, %c0_47, %c0_48] : memref<8x128x128xbf16, #tpu.memory_space<vmem>>, vector<1x128x128xbf16>
    %101 = vector.shape_cast %100 : vector<1x128x128xbf16> to vector<128x128xbf16>
    %cst_49 = arith.constant dense<0.000000e+00> : vector<16x128xf32>
    %102 = tpu.matmul %96, %101, %cst_49 {dimension_numbers = #tpu.dot_dimension_numbers<[1], [0], [0], [1], [0, 0, 1, 1], [], []>} : vector<16x128xbf16>, vector<128x128xbf16>, vector<16x128xf32> -> vector<16x128xf32>
    %c3_50 = arith.constant 3 : index
    %c0_51 = arith.constant 0 : index
    %c0_52 = arith.constant 0 : index
    %103 = vector.load %arg5[%c3_50, %c0_51, %c0_52] : memref<8x1x128xf32, #tpu.memory_space<vmem>>, vector<1x1x128xf32>
    %104 = vector.shape_cast %103 : vector<1x1x128xf32> to vector<1x128xf32>
    %105 = vector.broadcast %104 : vector<1x128xf32> to vector<16x128xf32>
    %106 = arith.addf %102, %105 : vector<16x128xf32>
    %107 = arith.truncf %106 : vector<16x128xf32> to vector<16x128xbf16>
    %108 = math.tanh %107 : vector<16x128xbf16>
    %109 = arith.extf %108 : vector<16x128xbf16> to vector<16x128xf32>
    %110 = arith.addf %95, %109 : vector<16x128xf32>
    %111 = arith.truncf %110 : vector<16x128xf32> to vector<16x128xbf16>
    %c4_53 = arith.constant 4 : index
    %c0_54 = arith.constant 0 : index
    %c0_55 = arith.constant 0 : index
    %112 = vector.load %arg9[%c4_53, %c0_54, %c0_55] : memref<9x16x128xbf16, #tpu.memory_space<vmem>>, vector<1x16x128xbf16>
    %113 = vector.shape_cast %112 : vector<1x16x128xbf16> to vector<16x128xbf16>
    %114 = vector.shape_cast %111 : vector<16x128xbf16> to vector<1x16x128xbf16>
    tpu.vector_store %arg9[%c4_53, %c0_54, %c0_55], %114 {strides = array<i32>} : memref<9x16x128xbf16, #tpu.memory_space<vmem>>, vector<1x16x128xbf16>,
    %c4_56 = arith.constant 4 : index
    %c0_57 = arith.constant 0 : index
    %c0_58 = arith.constant 0 : index
    %115 = vector.load %arg4[%c4_56, %c0_57, %c0_58] : memref<8x128x128xbf16, #tpu.memory_space<vmem>>, vector<1x128x128xbf16>
    %116 = vector.shape_cast %115 : vector<1x128x128xbf16> to vector<128x128xbf16>
    %cst_59 = arith.constant dense<0.000000e+00> : vector<16x128xf32>
    %117 = tpu.matmul %111, %116, %cst_59 {dimension_numbers = #tpu.dot_dimension_numbers<[1], [0], [0], [1], [0, 0, 1, 1], [], []>} : vector<16x128xbf16>, vector<128x128xbf16>, vector<16x128xf32> -> vector<16x128xf32>
    %c4_60 = arith.constant 4 : index
    %c0_61 = arith.constant 0 : index
    %c0_62 = arith.constant 0 : index
    %118 = vector.load %arg5[%c4_60, %c0_61, %c0_62] : memref<8x1x128xf32, #tpu.memory_space<vmem>>, vector<1x1x128xf32>
    %119 = vector.shape_cast %118 : vector<1x1x128xf32> to vector<1x128xf32>
    %120 = vector.broadcast %119 : vector<1x128xf32> to vector<16x128xf32>
    %121 = arith.addf %117, %120 : vector<16x128xf32>
    %122 = arith.truncf %121 : vector<16x128xf32> to vector<16x128xbf16>
    %123 = math.tanh %122 : vector<16x128xbf16>
    %124 = arith.extf %123 : vector<16x128xbf16> to vector<16x128xf32>
    %125 = arith.addf %110, %124 : vector<16x128xf32>
    %126 = arith.truncf %125 : vector<16x128xf32> to vector<16x128xbf16>
    %c5_63 = arith.constant 5 : index
    %c0_64 = arith.constant 0 : index
    %c0_65 = arith.constant 0 : index
    %127 = vector.load %arg9[%c5_63, %c0_64, %c0_65] : memref<9x16x128xbf16, #tpu.memory_space<vmem>>, vector<1x16x128xbf16>
    %128 = vector.shape_cast %127 : vector<1x16x128xbf16> to vector<16x128xbf16>
    %129 = vector.shape_cast %126 : vector<16x128xbf16> to vector<1x16x128xbf16>
    tpu.vector_store %arg9[%c5_63, %c0_64, %c0_65], %129 {strides = array<i32>} : memref<9x16x128xbf16, #tpu.memory_space<vmem>>, vector<1x16x128xbf16>,
    %c5_66 = arith.constant 5 : index
    %c0_67 = arith.constant 0 : index
    %c0_68 = arith.constant 0 : index
    %130 = vector.load %arg4[%c5_66, %c0_67, %c0_68] : memref<8x128x128xbf16, #tpu.memory_space<vmem>>, vector<1x128x128xbf16>
    %131 = vector.shape_cast %130 : vector<1x128x128xbf16> to vector<128x128xbf16>
    %cst_69 = arith.constant dense<0.000000e+00> : vector<16x128xf32>
    %132 = tpu.matmul %126, %131, %cst_69 {dimension_numbers = #tpu.dot_dimension_numbers<[1], [0], [0], [1], [0, 0, 1, 1], [], []>} : vector<16x128xbf16>, vector<128x128xbf16>, vector<16x128xf32> -> vector<16x128xf32>
    %c5_70 = arith.constant 5 : index
    %c0_71 = arith.constant 0 : index
    %c0_72 = arith.constant 0 : index
    %133 = vector.load %arg5[%c5_70, %c0_71, %c0_72] : memref<8x1x128xf32, #tpu.memory_space<vmem>>, vector<1x1x128xf32>
    %134 = vector.shape_cast %133 : vector<1x1x128xf32> to vector<1x128xf32>
    %135 = vector.broadcast %134 : vector<1x128xf32> to vector<16x128xf32>
    %136 = arith.addf %132, %135 : vector<16x128xf32>
    %137 = arith.truncf %136 : vector<16x128xf32> to vector<16x128xbf16>
    %138 = math.tanh %137 : vector<16x128xbf16>
    %139 = arith.extf %138 : vector<16x128xbf16> to vector<16x128xf32>
    %140 = arith.addf %125, %139 : vector<16x128xf32>
    %141 = arith.truncf %140 : vector<16x128xf32> to vector<16x128xbf16>
    %c6_73 = arith.constant 6 : index
    %c0_74 = arith.constant 0 : index
    %c0_75 = arith.constant 0 : index
    %142 = vector.load %arg9[%c6_73, %c0_74, %c0_75] : memref<9x16x128xbf16, #tpu.memory_space<vmem>>, vector<1x16x128xbf16>
    %143 = vector.shape_cast %142 : vector<1x16x128xbf16> to vector<16x128xbf16>
    %144 = vector.shape_cast %141 : vector<16x128xbf16> to vector<1x16x128xbf16>
    tpu.vector_store %arg9[%c6_73, %c0_74, %c0_75], %144 {strides = array<i32>} : memref<9x16x128xbf16, #tpu.memory_space<vmem>>, vector<1x16x128xbf16>,
    %c6_76 = arith.constant 6 : index
    %c0_77 = arith.constant 0 : index
    %c0_78 = arith.constant 0 : index
    %145 = vector.load %arg4[%c6_76, %c0_77, %c0_78] : memref<8x128x128xbf16, #tpu.memory_space<vmem>>, vector<1x128x128xbf16>
    %146 = vector.shape_cast %145 : vector<1x128x128xbf16> to vector<128x128xbf16>
    %cst_79 = arith.constant dense<0.000000e+00> : vector<16x128xf32>
    %147 = tpu.matmul %141, %146, %cst_79 {dimension_numbers = #tpu.dot_dimension_numbers<[1], [0], [0], [1], [0, 0, 1, 1], [], []>} : vector<16x128xbf16>, vector<128x128xbf16>, vector<16x128xf32> -> vector<16x128xf32>
    %c6_80 = arith.constant 6 : index
    %c0_81 = arith.constant 0 : index
    %c0_82 = arith.constant 0 : index
    %148 = vector.load %arg5[%c6_80, %c0_81, %c0_82] : memref<8x1x128xf32, #tpu.memory_space<vmem>>, vector<1x1x128xf32>
    %149 = vector.shape_cast %148 : vector<1x1x128xf32> to vector<1x128xf32>
    %150 = vector.broadcast %149 : vector<1x128xf32> to vector<16x128xf32>
    %151 = arith.addf %147, %150 : vector<16x128xf32>
    %152 = arith.truncf %151 : vector<16x128xf32> to vector<16x128xbf16>
    %153 = math.tanh %152 : vector<16x128xbf16>
    %154 = arith.extf %153 : vector<16x128xbf16> to vector<16x128xf32>
    %155 = arith.addf %140, %154 : vector<16x128xf32>
    %156 = arith.truncf %155 : vector<16x128xf32> to vector<16x128xbf16>
    %c7 = arith.constant 7 : index
    %c0_83 = arith.constant 0 : index
    %c0_84 = arith.constant 0 : index
    %157 = vector.load %arg9[%c7, %c0_83, %c0_84] : memref<9x16x128xbf16, #tpu.memory_space<vmem>>, vector<1x16x128xbf16>
    %158 = vector.shape_cast %157 : vector<1x16x128xbf16> to vector<16x128xbf16>
    %159 = vector.shape_cast %156 : vector<16x128xbf16> to vector<1x16x128xbf16>
    tpu.vector_store %arg9[%c7, %c0_83, %c0_84], %159 {strides = array<i32>} : memref<9x16x128xbf16, #tpu.memory_space<vmem>>, vector<1x16x128xbf16>,
    %c7_85 = arith.constant 7 : index
    %c0_86 = arith.constant 0 : index
    %c0_87 = arith.constant 0 : index
    %160 = vector.load %arg4[%c7_85, %c0_86, %c0_87] : memref<8x128x128xbf16, #tpu.memory_space<vmem>>, vector<1x128x128xbf16>
    %161 = vector.shape_cast %160 : vector<1x128x128xbf16> to vector<128x128xbf16>
    %cst_88 = arith.constant dense<0.000000e+00> : vector<16x128xf32>
    %162 = tpu.matmul %156, %161, %cst_88 {dimension_numbers = #tpu.dot_dimension_numbers<[1], [0], [0], [1], [0, 0, 1, 1], [], []>} : vector<16x128xbf16>, vector<128x128xbf16>, vector<16x128xf32> -> vector<16x128xf32>
    %c7_89 = arith.constant 7 : index
    %c0_90 = arith.constant 0 : index
    %c0_91 = arith.constant 0 : index
    %163 = vector.load %arg5[%c7_89, %c0_90, %c0_91] : memref<8x1x128xf32, #tpu.memory_space<vmem>>, vector<1x1x128xf32>
    %164 = vector.shape_cast %163 : vector<1x1x128xf32> to vector<1x128xf32>
    %165 = vector.broadcast %164 : vector<1x128xf32> to vector<16x128xf32>
    %166 = arith.addf %162, %165 : vector<16x128xf32>
    %167 = arith.truncf %166 : vector<16x128xf32> to vector<16x128xbf16>
    %168 = math.tanh %167 : vector<16x128xbf16>
    %169 = arith.extf %168 : vector<16x128xbf16> to vector<16x128xf32>
    %170 = arith.addf %155, %169 : vector<16x128xf32>
    %171 = arith.truncf %170 : vector<16x128xf32> to vector<16x128xbf16>
    %c8 = arith.constant 8 : index
    %c0_92 = arith.constant 0 : index
    %c0_93 = arith.constant 0 : index
    %172 = vector.load %arg9[%c8, %c0_92, %c0_93] : memref<9x16x128xbf16, #tpu.memory_space<vmem>>, vector<1x16x128xbf16>
    %173 = vector.shape_cast %172 : vector<1x16x128xbf16> to vector<16x128xbf16>
    %174 = vector.shape_cast %171 : vector<16x128xbf16> to vector<1x16x128xbf16>
    tpu.vector_store %arg9[%c8, %c0_92, %c0_93], %174 {strides = array<i32>} : memref<9x16x128xbf16, #tpu.memory_space<vmem>>, vector<1x16x128xbf16>,
    %c0_94 = arith.constant 0 : index
    %c0_95 = arith.constant 0 : index
    %175 = vector.load %arg6[%c0_94, %c0_95] : memref<128x2xbf16, #tpu.memory_space<vmem>>, vector<128x2xbf16>
    %cst_96 = arith.constant dense<0.000000e+00> : vector<16x2xf32>
    %176 = tpu.matmul %171, %175, %cst_96 {dimension_numbers = #tpu.dot_dimension_numbers<[1], [0], [0], [1], [0, 0, 1, 1], [], []>} : vector<16x128xbf16>, vector<128x2xbf16>, vector<16x2xf32> -> vector<16x2xf32>
    %c0_97 = arith.constant 0 : index
    %c0_98 = arith.constant 0 : index
    %177 = vector.load %arg7[%c0_97, %c0_98] : memref<1x2xf32, #tpu.memory_space<vmem>>, vector<1x2xf32>
    %178 = vector.broadcast %177 : vector<1x2xf32> to vector<16x2xf32>
    %179 = arith.addf %176, %178 : vector<16x2xf32>
    %c0_99 = arith.constant 0 : index
    %c0_100 = arith.constant 0 : index
    %180 = vector.load %arg8[%c0_99, %c0_100] : memref<16x2xf32, #tpu.memory_space<vmem>>, vector<16x2xf32>
    tpu.vector_store %arg8[%c0_99, %c0_100], %179 {strides = array<i32>} : memref<16x2xf32, #tpu.memory_space<vmem>>, vector<16x2xf32>,
    return
  }
  func.func @transform_0(%arg0: i32) -> (i32, i32) {
    %c0_i32 = arith.constant 0 : i32
    %c0_i32_0 = arith.constant 0 : i32
    return %arg0, %c0_i32 : i32, i32
  }
  func.func @transform_1(%arg0: i32) -> (i32, i32) {
    %c0_i32 = arith.constant 0 : i32
    %c0_i32_0 = arith.constant 0 : i32
    %c0_i32_1 = arith.constant 0 : i32
    return %c0_i32, %c0_i32_0 : i32, i32
  }
  func.func @transform_2(%arg0: i32) -> (i32, i32) {
    %c0_i32 = arith.constant 0 : i32
    %c0_i32_0 = arith.constant 0 : i32
    %c0_i32_1 = arith.constant 0 : i32
    return %c0_i32, %c0_i32_0 : i32, i32
  }
  func.func @transform_3(%arg0: i32) -> (i32, i32, i32) {
    %c0_i32 = arith.constant 0 : i32
    %c0_i32_0 = arith.constant 0 : i32
    %c0_i32_1 = arith.constant 0 : i32
    %c0_i32_2 = arith.constant 0 : i32
    return %c0_i32, %c0_i32_0, %c0_i32_1 : i32, i32, i32
  }
  func.func @transform_4(%arg0: i32) -> (i32, i32, i32) {
    %c0_i32 = arith.constant 0 : i32
    %c0_i32_0 = arith.constant 0 : i32
    %c0_i32_1 = arith.constant 0 : i32
    %c0_i32_2 = arith.constant 0 : i32
    return %c0_i32, %c0_i32_0, %c0_i32_1 : i32, i32, i32
  }
  func.func @transform_5(%arg0: i32) -> (i32, i32) {
    %c0_i32 = arith.constant 0 : i32
    %c0_i32_0 = arith.constant 0 : i32
    %c0_i32_1 = arith.constant 0 : i32
    return %c0_i32, %c0_i32_0 : i32, i32
  }
  func.func @transform_6(%arg0: i32) -> (i32, i32) {
    %c0_i32 = arith.constant 0 : i32
    %c0_i32_0 = arith.constant 0 : i32
    %c0_i32_1 = arith.constant 0 : i32
    return %c0_i32, %c0_i32_0 : i32, i32
  }
  func.func @transform_7(%arg0: i32) -> (i32, i32) {
    %c0_i32 = arith.constant 0 : i32
    %c0_i32_0 = arith.constant 0 : i32
    return %arg0, %c0_i32 : i32, i32
  }
  func.func @transform_8(%arg0: i32) -> (i32, i32, i32) {
    %c0_i32 = arith.constant 0 : i32
    %c0_i32_0 = arith.constant 0 : i32
    %c0_i32_1 = arith.constant 0 : i32
    return %c0_i32, %arg0, %c0_i32_0 : i32, i32, i32
  }
}

</mosaic_0001>

<bundles_post_ra>
// kernel: score_model_forward.1
= control target key start
LH: loop header
LB: loop body
LE: loop exit
PB: predicated region body
PF: predicated region fallthrough
CT: control target
= control target key end

     0   :  { %v2050_v0 = vmov 1   ;;  %v2051_v1 = vmov 0   ;;  %v2052_v15 = vmov 0.0   ;;  %v2053_v17 = vmov 2   ;;  %s2497_s0 = inlined_call_operand.vmem [shape: f32[16,8], index: 0, kind: input, shape index: {}]   ;;  %s2498_s3 = inlined_call_operand.vmem [shape: bf16[8,128,128], index: 3, kind: input, shape index: {}]   ;;  %s2499_s1 = inlined_call_operand.vmem [shape: f32[8,128], index: 1, kind: input, shape index: {}]   ;;  %s2500_s2 = inlined_call_operand.vmem [shape: f32[1,128], index: 2, kind: input, shape index: {}]   ;;  %s2501_s8 = inlined_call_operand.vmem [shape: bf16[9,16,128], index: 8, kind: output, shape index: {1}]   ;;  %s2502_s4 = inlined_call_operand.vmem [shape: f32[8,1,128], index: 4, kind: input, shape index: {}]   ;;  %s2503_s5 = inlined_call_operand.vmem [shape: bf16[128,2], index: 5, kind: input, shape index: {}]   ;;  %s2504_s6 = inlined_call_operand.vmem [shape: f32[1,2], index: 6, kind: input, shape index: {}]   ;;  %s2505_s7 = inlined_call_operand.vmem [shape: f32[16,2], index: 7, kind: output, shape index: {0}]  }
   0x1   :  { %1943 = vset.pattern.permute.xlu1 %v2050_v0  ;;  %1942 = vset.pattern.permute.xlu0 %v2051_v1  ;;  %v29_v2 = vld [vmem:[%s2497_s0] sm:$0xff]  ;;  %v30_v3 = vld [vmem:[%s2497_s0 + $0x8] sm:$0xff]  ;;  %v1952_v22 = vld [vmem:[%s2498_s3 + $0x10] sm:$0xff]   ;;  %v2054_v26 = vmov 3   ;;  %vm2055_vm0 = vmmov 0   ;;  %vm1351_vm1 = vcmask 15360  }
   0x2   :  { %77 = vperm.xlu1 %1943, %v29_v2   ;;  %v31_v4 = vmul.f32 -3.0, %v29_v2  ;;  %v37_v5 = vmul.f32 -12.0, %v29_v2  ;;  %53 = vperm.xlu0 %1942, %v29_v2   ;;  %v32_v6 = vmul.f32 -3.0, %v30_v3  ;;  %v38_v7 = vmul.f32 -12.0, %v30_v3  ;;  %v1950_v16 = vld [vmem:[%s2498_s3] sm:$0xff]   ;;  %v1951_v19 = vld [vmem:[%s2498_s3 + $0x8] sm:$0xff]  }
   0x3   :  { %v43_v9 = vmul.f32 -6.0, %v29_v2  ;;  %v44_v14 = vmul.f32 -6.0, %v30_v3  ;;  %1756 = vmatprep.subr.bf16.mxu0 %v2052_v15  ;;  %1776 = vmatprep.subr.bf16.mxu1 %v2052_v15  ;;  %v1953_v25 = vld [vmem:[%s2498_s3 + $0x18] sm:$0xff]   ;;  %v1954_v27 = vld [vmem:[%s2498_s3 + $0x20] sm:$0xff]   ;;  %v1955_v29 = vld [vmem:[%s2498_s3 + $0x28] sm:$0xff]  }
   0x4   :  { %v33_v8 = vmul.f32 1.442695, %v31_v4  ;;  %v39_v10 = vmul.f32 1.442695, %v37_v5  ;;  %v35_v11 = vmul.f32 1.442695, %v32_v6  ;;  %1757 = vmatpush3.bf16.msra.mxu0 %v1950_v16  ;;  %1772 = vmatprep.mubr.msk.bf16.mxu0 %vm2055_vm0, %v2052_v15 }
   0x5   :  { %v41_v12 = vmul.f32 1.442695, %v38_v7  ;;  %v45_v13 = vmul.f32 1.442695, %v43_v9  ;;  %v47_v18 = vmul.f32 1.442695, %v44_v14  ;;  %1758 = vmatprep.subr.bf16.mxu0 %v2052_v15  ;;  %1792 = vmatprep.mubr.msk.bf16.mxu1 %vm2055_vm0, %v2052_v15 }
   0x6   :  { %81 = vperm.xlu1 %1943, %v30_v3   ;;  %58 = vperm.xlu0 %1942, %v30_v3   ;;  %2022 = vpow2.f32 %v33_v8  ;;  %v1956_v31 = vld [vmem:[%s2498_s3 + $0x30] sm:$0xff]   ;;  %v1957_v32 = vld [vmem:[%s2498_s3 + $0x38] sm:$0xff]   ;;  %v1958_v33 = vld [vmem:[%s2498_s3 + $0x40] sm:$0xff]  }
   0x7   :  { %2024 = vpow2.f32 %v35_v11  ;;  %v1959_v34 = vld [vmem:[%s2498_s3 + $0x48] sm:$0xff]   ;;  %1777 = vmatpush3.bf16.msra.mxu1 %v1958_v33  ;;  %v1362_v41 = vld [vmem:[%s2499_s1] ss:$0 sm:$0xff]  ;;  %v1364_v46 = vld [vmem:[%s2499_s1 + $0x1] ss:$0 sm:$0xff] }
   0x8   :  { %2026 = vpow2.f32 %v41_v12  ;;  %1759 = vmatpush3.bf16.msra.mxu0 %v1951_v19  ;;  %1778 = vmatprep.subr.bf16.mxu1 %v2052_v15  ;;  %v1363_v47 = vld [vmem:[%s2500_s2] ss:$0 sm:$0xff]  ;;  %v1365_v50 = vld [vmem:[%s2499_s1 + $0x2] ss:$0 sm:$0xff]  ;;  %v1366_v55 = vld [vmem:[%s2499_s1 + $0x3] ss:$0 sm:$0xff] }
   0x9   :  { %2028 = vpow2.f32 %v39_v10  ;;  %1760 = vmatprep.subr.bf16.mxu0 %v2052_v15  ;;  %v1367_v60 = vld [vmem:[%s2499_s1 + $0x4] ss:$0 sm:$0xff]  ;;  %v1368_v0 = vld [vmem:[%s2499_s1 + $0x5] ss:$0 sm:$0xff]  ;;  %v1369_v6 = vld [vmem:[%s2499_s1 + $0x6] ss:$0 sm:$0xff] }
   0xa   :  { %1945 = vset.pattern.permute.xlu1 %v2053_v17  ;;  %1944 = vset.pattern.permute.xlu0 %v2053_v17  ;;  %2030 = vpow2.f32 %v45_v13 }
   0xb   :  { %98 = vperm.xlu1 %1945, %v30_v3   ;;  %94 = vperm.xlu0 %1944, %v29_v2   ;;  %2032 = vpow2.f32 %v47_v18 }
   0xc   :  { %1761 = vmatpush3.bf16.msra.mxu0 %v1952_v22  ;;  %1779 = vmatpush3.bf16.msra.mxu1 %v1959_v34 }
   0xd   :  { %1762 = vmatprep.subr.bf16.mxu0 %v2052_v15  ;;  %1780 = vmatprep.subr.bf16.mxu1 %v2052_v15 }
  0x10   :  { %v2023_v20 = vpop.eup %2022  ;;  %1763 = vmatpush3.bf16.msra.mxu0 %v1953_v25  ;;  %v1962_v25 = vld [vmem:[%s2498_s3 + $0x60] sm:$0xff]  }
  0x11   :  { %v2025_v21 = vpop.eup %2024  ;;  %112 = vperm.xlu1 %1945, %v2023_v20   ;;  %1764 = vmatprep.subr.bf16.mxu0 %v2052_v15 }
  0x12   :  { %v2027_v23 = vpop.eup %2026  ;;  %117 = vperm.xlu0 %1944, %v2025_v21  }
  0x13   :  { %v2029_v24 = vpop.eup %2028 }
  0x14   :  { %v2031_v28 = vpop.eup %2030  ;;  %1765 = vmatpush3.bf16.msra.mxu0 %v1954_v27  ;;  %v1964_v27 = vld [vmem:[%s2498_s3 + $0x70] sm:$0xff]  }
  0x15   :  { %131 = vperm.xlu1 %1945, %v2029_v24   ;;  %1766 = vmatprep.subr.bf16.mxu0 %v2052_v15  ;;  %v2033_v30 = vpop.eup %2032  ;;  %v1961_v24 = vld [vmem:[%s2498_s3 + $0x58] sm:$0xff]  }
  0x16   :  { %136 = vperm.xlu0 %1944, %v2027_v23   ;;  %v1960_v23 = vld [vmem:[%s2498_s3 + $0x50] sm:$0xff]  }
  0x17   :  { %1781 = vmatpush3.bf16.msra.mxu1 %v1960_v23 }
  0x18   :  { %1767 = vmatpush3.bf16.msra.mxu0 %v1955_v29  ;;  %1782 = vmatprep.subr.bf16.mxu1 %v2052_v15  ;;  %v1966_v29 = vld [vmem:[%s2498_s3 + $0x80] sm:$0xff]  }
  0x19   :  { %1946 = vset.pattern.permute.xlu1 %v2054_v26  ;;  %1768 = vmatprep.subr.bf16.mxu0 %v2052_v15 }
  0x1a   :  { %1947 = vset.pattern.permute.xlu0 %v2054_v26  ;;  %149 = vperm.xlu1 %1946, %v29_v2   ;;  %v1963_v26 = vld [vmem:[%s2498_s3 + $0x68] sm:$0xff]  }
  0x1b   :  { %153 = vperm.xlu0 %1947, %v30_v3   ;;  %1783 = vmatpush3.bf16.msra.mxu1 %v1961_v24 }
  0x1c   :  { %1769 = vmatpush3.bf16.msra.mxu0 %v1956_v31  ;;  %1784 = vmatprep.subr.bf16.mxu1 %v2052_v15  ;;  %v1372_v31 = vld [vmem:[%s2502_s4] ss:$0 sm:$0xff] }
  0x1d   :  { %1770 = vmatprep.subr.bf16.mxu0 %v2052_v15 }
  0x1e   :  { %1948 = vset.pattern.permute.xlu1 %v2053_v17 }
  0x1f   :  { %167 = vperm.xlu1 %1948, %v2031_v28   ;;  %1949 = vset.pattern.permute.xlu0 %v2053_v17  ;;  %v1965_v28 = vld [vmem:[%s2498_s3 + $0x78] sm:$0xff]  }
  0x20   :  { %1771 = vmatpush3.bf16.msra.mxu0 %v1957_v32  ;;  %1785 = vmatpush3.bf16.msra.mxu1 %v1962_v25 }
  0x21   :  { %1796 = vmatprep.subr.bf16.mxu0 %v2052_v15  ;;  %1786 = vmatprep.subr.bf16.mxu1 %v2052_v15 }
  0x23   :  { %172 = vperm.xlu1 %1948, %v2033_v30   ;;  %v1967_v30 = vld [vmem:[%s2498_s3 + $0x88] sm:$0xff]  }
  0x24   :  { %1787 = vmatpush3.bf16.msra.mxu1 %v1963_v26  ;;  %v1984_v26 = vld [vmem:[%s2498_s3 + $0x110] sm:$0xff]  }
  0x25   :  { %1788 = vmatprep.subr.bf16.mxu1 %v2052_v15 }
  0x28   :  { %1789 = vmatpush3.bf16.msra.mxu1 %v1964_v27  ;;  %v1985_v27 = vld [vmem:[%s2498_s3 + $0x118] sm:$0xff]  }
  0x29   :  { %1790 = vmatprep.subr.bf16.mxu1 %v2052_v15 }
  0x2c   :  { %1791 = vmatpush3.bf16.msra.mxu1 %v1965_v28  ;;  %v1986_v28 = vld [vmem:[%s2498_s3 + $0x120] sm:$0xff]  }
  0x2d   :  { %1816 = vmatprep.subr.bf16.mxu1 %v2052_v15 }
  0x81   :  { %v78_v35 = vpop.permute.xlu1 %77  ;;  %v54_v36 = vpop.permute.xlu0 %53 }
  0x82   :  { %v65_v45 = vmul.f32 %v1362_v41, %v54_v36  ;;  %v88_v52 = vmul.f32 %v1364_v46, %v78_v35 }
  0x84   :  { %v73_v53 = vadd.f32 %v1363_v47, %v65_v45  ;;  %v1968_v45 = vld [vmem:[%s2498_s3 + $0x90] sm:$0xff]  }
  0x85   :  { %v82_v37 = vpop.permute.xlu1 %81  ;;  %v59_v38 = vpop.permute.xlu0 %58 }
  0x86   :  { %v66_v43 = vmul.f32 %v1362_v41, %v59_v38  ;;  %v89_v54 = vmul.f32 %v1364_v46, %v82_v37  ;;  %v90_v61 = vadd.f32 %v88_v52, %v73_v53  ;;  %v1969_v46 = vld [vmem:[%s2498_s3 + $0x98] sm:$0xff]   ;;  %v1975_v52 = vld [vmem:[%s2498_s3 + $0xc8] sm:$0xff]   ;;  %v1402_v53 = vld [vmem:[%s2502_s4 + $0x1] ss:$0 sm:$0xff] }
  0x88   :  { %v74_v49 = vadd.f32 %v1363_v47, %v66_v43  ;;  %v1970_v47 = vld [vmem:[%s2498_s3 + $0xa0] sm:$0xff]  }
  0x8a   :  { %v99_v39 = vpop.permute.xlu1 %98  ;;  %v95_v40 = vpop.permute.xlu0 %94  ;;  %v91_v56 = vadd.f32 %v89_v54, %v74_v49  ;;  %v1972_v49 = vld [vmem:[%s2498_s3 + $0xb0] sm:$0xff]  }
  0x8b   :  { %v106_v57 = vmul.f32 %v1365_v50, %v99_v39  ;;  %v105_v58 = vmul.f32 %v1365_v50, %v95_v40  ;;  %v1973_v50 = vld [vmem:[%s2498_s3 + $0xb8] sm:$0xff]  }
  0x8d   :  { %v108_v2 = vadd.f32 %v106_v57, %v91_v56  ;;  %v107_v3 = vadd.f32 %v105_v58, %v90_v61 }
  0x90   :  { %v113_v42 = vpop.permute.xlu1 %112 }
  0x91   :  { %v118_v44 = vpop.permute.xlu0 %117  ;;  %v124_v63 = vmul.f32 %v1366_v55, %v113_v42 }
  0x92   :  { %v125_v62 = vmul.f32 %v1366_v55, %v118_v44 }
  0x93   :  { %v126_v9 = vadd.f32 %v124_v63, %v107_v3  ;;  %v1976_v3 = vld [vmem:[%s2498_s3 + $0xd0] sm:$0xff]  }
  0x94   :  { %v132_v48 = vpop.permute.xlu1 %131  ;;  %v127_v8 = vadd.f32 %v125_v62, %v108_v2 }
  0x95   :  { %v137_v51 = vpop.permute.xlu0 %136  ;;  %v143_v5 = vmul.f32 %v1367_v60, %v132_v48  ;;  %v1971_v48 = vld [vmem:[%s2498_s3 + $0xa8] sm:$0xff]  }
  0x96   :  { %v144_v4 = vmul.f32 %v1367_v60, %v137_v51  ;;  %v1974_v51 = vld [vmem:[%s2498_s3 + $0xc0] sm:$0xff]  }
  0x97   :  { %v145_v13 = vadd.f32 %v143_v5, %v126_v9  ;;  %v1978_v5 = vld [vmem:[%s2498_s3 + $0xe0] sm:$0xff]  }
  0x98   :  { %v146_v12 = vadd.f32 %v144_v4, %v127_v8  ;;  %v1977_v4 = vld [vmem:[%s2498_s3 + $0xd8] sm:$0xff]   ;;  %v1982_v9 = vld [vmem:[%s2498_s3 + $0x100] sm:$0xff]  }
  0x99   :  { %v150_v59 = vpop.permute.xlu1 %149  ;;  %v1981_v8 = vld [vmem:[%s2498_s3 + $0xf8] sm:$0xff]  }
  0x9a   :  { %v154_v1 = vpop.permute.xlu0 %153  ;;  %v160_v11 = vmul.f32 %v1368_v0, %v150_v59 }
  0x9b   :  { %v161_v10 = vmul.f32 %v1368_v0, %v154_v1 }
  0x9c   :  { %v162_v18 = vadd.f32 %v160_v11, %v145_v13  ;;  %v1432_v11 = vld [vmem:[%s2502_s4 + $0x2] ss:$0 sm:$0xff] }
  0x9d   :  { %v163_v17 = vadd.f32 %v161_v10, %v146_v12  ;;  %v1983_v10 = vld [vmem:[%s2498_s3 + $0x108] sm:$0xff]  }
  0x9e   :  { %v168_v7 = vpop.permute.xlu1 %167 }
  0x9f   :  { %v179_v14 = vmul.f32 %v1369_v6, %v168_v7  ;;  %v1980_v7 = vld [vmem:[%s2498_s3 + $0xf0] sm:$0xff]  }
  0xa1   :  { %v181_v20 = vadd.f32 %v179_v14, %v162_v18 }
  0xa2   :  { %v173_v16 = vpop.permute.xlu1 %172 }
  0xa3   :  { %v180_v19 = vmul.f32 %v1369_v6, %v173_v16  ;;  %v1979_v6 = vld [vmem:[%s2498_s3 + $0xe8] sm:$0xff]  }
  0xa5   :  { %v182_v21 = vadd.f32 %v180_v19, %v163_v17 }
  0xa7   :  { %v183_v22 = vpack.c.bf16 %v182_v21, %v181_v20 }
  0xa9   :  { %1626 = vst [vmem:[%s2501_s8] sm:$0xff] %v183_v22   ;;  %1773 = vmatmul.mubr.bf16.vlgmr.msra.gmra.mrb[0].mxu0 %v183_v22 }
  0xaa   :  { %1812 = vmatprep.mubr.msk.bf16.mxu0 %vm2055_vm0, %v2052_v15  ;;  %1797 = vmatpush3.bf16.msra.mxu0 %v1966_v29  ;;  %v1987_v29 = vld [vmem:[%s2498_s3 + $0x128] sm:$0xff]  }
  0xab   :  { %1798 = vmatprep.subr.bf16.mxu0 %v2052_v15 }
  0xae   :  { %1799 = vmatpush3.bf16.msra.mxu0 %v1967_v30  ;;  %v1988_v30 = vld [vmem:[%s2498_s3 + $0x130] sm:$0xff]  }
  0xaf   :  { %1800 = vmatprep.subr.bf16.mxu0 %v2052_v15 }
  0xb2   :  { %1801 = vmatpush3.bf16.msra.mxu0 %v1968_v45 }
  0xb3   :  { %1802 = vmatprep.subr.bf16.mxu0 %v2052_v15 }
  0xb6   :  { %1803 = vmatpush3.bf16.msra.mxu0 %v1969_v46 }
  0xb7   :  { %1804 = vmatprep.subr.bf16.mxu0 %v2052_v15 }
  0xba   :  { %1805 = vmatpush3.bf16.msra.mxu0 %v1970_v47 }
  0xbb   :  { %1806 = vmatprep.subr.bf16.mxu0 %v2052_v15 }
  0xbe   :  { %1807 = vmatpush3.bf16.msra.mxu0 %v1971_v48  ;;  %v1992_v48 = vld [vmem:[%s2498_s3 + $0x150] sm:$0xff]  }
  0xbf   :  { %1808 = vmatprep.subr.bf16.mxu0 %v2052_v15 }
  0xc2   :  { %1809 = vmatpush3.bf16.msra.mxu0 %v1972_v49  ;;  %v1993_v49 = vld [vmem:[%s2498_s3 + $0x158] sm:$0xff]  }
  0xc3   :  { %1810 = vmatprep.subr.bf16.mxu0 %v2052_v15 }
  0xc6   :  { %1811 = vmatpush3.bf16.msra.mxu0 %v1973_v50  ;;  %v1994_v50 = vld [vmem:[%s2498_s3 + $0x160] sm:$0xff]  }
  0xc7   :  { %1836 = vmatprep.subr.bf16.mxu0 %v2052_v15 }
 0x17c   :  { %v298_v32 = vpop.f32.mrb[0].mxu0 }
 0x17d   :  { %v1774_v33 = vpop.f32.mrb[1].mxu0  ;;  %v299_v35 = vadd.f32 %v1372_v31, %v298_v32  ;;  %v1990_v32 = vld [vmem:[%s2498_s3 + $0x140] sm:$0xff]  }
 0x17e   :  { %v301_v34 = vpop.f32.mrb[2].mxu0  ;;  %v1991_v33 = vld [vmem:[%s2498_s3 + $0x148] sm:$0xff]  }
 0x17f   :  { %v302_v36 = vadd.f32 %v1372_v31, %v301_v34  ;;  %v1775_v37 = vpop.f32.mrb[3].mxu0  ;;  %v1989_v31 = vld [vmem:[%s2498_s3 + $0x138] sm:$0xff]   ;;  %v1462_v34 = vld [vmem:[%s2502_s4 + $0x3] ss:$0 sm:$0xff] }
 0x181   :  { %v305_v38 = vpack.c.bf16 %v302_v36, %v299_v35 }
 0x183   :  { %2034 = vtanh.bf16 %v305_v38 }
 0x18e   :  { %v2035_v39 = vpop.eup %2034 }
 0x18f   :  { %v307_v40 = vunpack.c.l.bf16 %v2035_v39  ;;  %v308_v41 = vunpack.c.h.bf16 %v2035_v39 }
 0x191   :  { %v309_v42 = vadd.f32 %v307_v40, %v181_v20  ;;  %v310_v43 = vadd.f32 %v308_v41, %v182_v21 }
 0x193   :  { %v311_v44 = vpack.c.bf16 %v310_v43, %v309_v42 }
 0x195   :  { %1667 = vst [vmem:[%s2501_s8 + $0x8] sm:$0xff] %v311_v44   ;;  %1793 = vmatmul.mubr.bf16.vlgmr.msra.gmra.mrb[0].mxu1 %v311_v44 }
 0x196   :  { %1832 = vmatprep.mubr.msk.bf16.mxu1 %vm2055_vm0, %v2052_v15  ;;  %1817 = vmatpush3.bf16.msra.mxu1 %v1974_v51  ;;  %v1995_v51 = vld [vmem:[%s2498_s3 + $0x168] sm:$0xff]  }
 0x197   :  { %1818 = vmatprep.subr.bf16.mxu1 %v2052_v15 }
 0x19a   :  { %1819 = vmatpush3.bf16.msra.mxu1 %v1975_v52  ;;  %v1996_v52 = vld [vmem:[%s2498_s3 + $0x170] sm:$0xff]  }
 0x19b   :  { %1820 = vmatprep.subr.bf16.mxu1 %v2052_v15 }
 0x19e   :  { %1821 = vmatpush3.bf16.msra.mxu1 %v1976_v3 }
 0x19f   :  { %1822 = vmatprep.subr.bf16.mxu1 %v2052_v15 }
 0x1a2   :  { %1823 = vmatpush3.bf16.msra.mxu1 %v1977_v4 }
 0x1a3   :  { %1824 = vmatprep.subr.bf16.mxu1 %v2052_v15 }
 0x1a6   :  { %1825 = vmatpush3.bf16.msra.mxu1 %v1978_v5 }
 0x1a7   :  { %1826 = vmatprep.subr.bf16.mxu1 %v2052_v15 }
 0x1aa   :  { %1827 = vmatpush3.bf16.msra.mxu1 %v1979_v6  ;;  %v2000_v6 = vld [vmem:[%s2498_s3 + $0x190] sm:$0xff]  }
 0x1ab   :  { %1828 = vmatprep.subr.bf16.mxu1 %v2052_v15 }
 0x1ae   :  { %1829 = vmatpush3.bf16.msra.mxu1 %v1980_v7  ;;  %v2001_v7 = vld [vmem:[%s2498_s3 + $0x198] sm:$0xff]  }
 0x1af   :  { %1830 = vmatprep.subr.bf16.mxu1 %v2052_v15 }
 0x1b2   :  { %1831 = vmatpush3.bf16.msra.mxu1 %v1981_v8  ;;  %v2002_v8 = vld [vmem:[%s2498_s3 + $0x1a0] sm:$0xff]  }
 0x1b3   :  { %1856 = vmatprep.subr.bf16.mxu1 %v2052_v15 }
 0x268   :  { %v429_v54 = vpop.f32.mrb[0].mxu1 }
 0x269   :  { %v1794_v55 = vpop.f32.mrb[1].mxu1  ;;  %v430_v57 = vadd.f32 %v1402_v53, %v429_v54  ;;  %v1998_v54 = vld [vmem:[%s2498_s3 + $0x180] sm:$0xff]  }
 0x26a   :  { %v432_v56 = vpop.f32.mrb[2].mxu1  ;;  %v1999_v55 = vld [vmem:[%s2498_s3 + $0x188] sm:$0xff]  }
 0x26b   :  { %v433_v58 = vadd.f32 %v1402_v53, %v432_v56  ;;  %v1795_v59 = vpop.f32.mrb[3].mxu1  ;;  %v1997_v53 = vld [vmem:[%s2498_s3 + $0x178] sm:$0xff]   ;;  %v1492_v56 = vld [vmem:[%s2502_s4 + $0x4] ss:$0 sm:$0xff] }
 0x26d   :  { %v436_v60 = vpack.c.bf16 %v433_v58, %v430_v57 }
 0x26f   :  { %2036 = vtanh.bf16 %v436_v60 }
 0x27a   :  { %v2037_v61 = vpop.eup %2036 }
 0x27b   :  { %v438_v62 = vunpack.c.l.bf16 %v2037_v61  ;;  %v439_v63 = vunpack.c.h.bf16 %v2037_v61 }
 0x27d   :  { %v440_v0 = vadd.f32 %v438_v62, %v309_v42  ;;  %v441_v1 = vadd.f32 %v439_v63, %v310_v43 }
 0x27f   :  { %v442_v2 = vpack.c.bf16 %v441_v1, %v440_v0 }
 0x281   :  { %1668 = vst [vmem:[%s2501_s8 + $0x10] sm:$0xff] %v442_v2   ;;  %1813 = vmatmul.mubr.bf16.vlgmr.msra.gmra.mrb[4].mxu0 %v442_v2 }
 0x282   :  { %1852 = vmatprep.mubr.msk.bf16.mxu0 %vm2055_vm0, %v2052_v15  ;;  %1837 = vmatpush3.bf16.msra.mxu0 %v1982_v9  ;;  %v2003_v9 = vld [vmem:[%s2498_s3 + $0x1a8] sm:$0xff]  }
 0x283   :  { %1838 = vmatprep.subr.bf16.mxu0 %v2052_v15 }
 0x286   :  { %1839 = vmatpush3.bf16.msra.mxu0 %v1983_v10  ;;  %v2004_v10 = vld [vmem:[%s2498_s3 + $0x1b0] sm:$0xff]  }
 0x287   :  { %1840 = vmatprep.subr.bf16.mxu0 %v2052_v15 }
 0x28a   :  { %1841 = vmatpush3.bf16.msra.mxu0 %v1984_v26 }
 0x28b   :  { %1842 = vmatprep.subr.bf16.mxu0 %v2052_v15 }
 0x28e   :  { %1843 = vmatpush3.bf16.msra.mxu0 %v1985_v27 }
 0x28f   :  { %1844 = vmatprep.subr.bf16.mxu0 %v2052_v15 }
 0x292   :  { %1845 = vmatpush3.bf16.msra.mxu0 %v1986_v28 }
 0x293   :  { %1846 = vmatprep.subr.bf16.mxu0 %v2052_v15 }
 0x296   :  { %1847 = vmatpush3.bf16.msra.mxu0 %v1987_v29  ;;  %v2008_v29 = vld [vmem:[%s2498_s3 + $0x1d0] sm:$0xff]  }
 0x297   :  { %1848 = vmatprep.subr.bf16.mxu0 %v2052_v15 }
 0x29a   :  { %1849 = vmatpush3.bf16.msra.mxu0 %v1988_v30  ;;  %v2009_v30 = vld [vmem:[%s2498_s3 + $0x1d8] sm:$0xff]  }
 0x29b   :  { %1850 = vmatprep.subr.bf16.mxu0 %v2052_v15 }
 0x29e   :  { %1851 = vmatpush3.bf16.msra.mxu0 %v1989_v31  ;;  %v2010_v31 = vld [vmem:[%s2498_s3 + $0x1e0] sm:$0xff]  }
 0x29f   :  { %1876 = vmatprep.subr.bf16.mxu0 %v2052_v15 }
 0x354   :  { %v560_v12 = vpop.f32.mrb[4].mxu0 }
 0x355   :  { %v1814_v13 = vpop.f32.mrb[5].mxu0  ;;  %v561_v16 = vadd.f32 %v1432_v11, %v560_v12  ;;  %v2006_v12 = vld [vmem:[%s2498_s3 + $0x1c0] sm:$0xff]  }
 0x356   :  { %v563_v14 = vpop.f32.mrb[6].mxu0  ;;  %v2007_v13 = vld [vmem:[%s2498_s3 + $0x1c8] sm:$0xff]  }
 0x357   :  { %v564_v17 = vadd.f32 %v1432_v11, %v563_v14  ;;  %v1815_v18 = vpop.f32.mrb[7].mxu0  ;;  %v2005_v11 = vld [vmem:[%s2498_s3 + $0x1b8] sm:$0xff]   ;;  %v1522_v14 = vld [vmem:[%s2502_s4 + $0x5] ss:$0 sm:$0xff] }
 0x359   :  { %v567_v19 = vpack.c.bf16 %v564_v17, %v561_v16 }
 0x35b   :  { %2038 = vtanh.bf16 %v567_v19 }
 0x366   :  { %v2039_v20 = vpop.eup %2038 }
 0x367   :  { %v569_v21 = vunpack.c.l.bf16 %v2039_v20  ;;  %v570_v22 = vunpack.c.h.bf16 %v2039_v20 }
 0x369   :  { %v571_v23 = vadd.f32 %v569_v21, %v440_v0  ;;  %v572_v24 = vadd.f32 %v570_v22, %v441_v1 }
 0x36b   :  { %v573_v25 = vpack.c.bf16 %v572_v24, %v571_v23 }
 0x36d   :  { %1669 = vst [vmem:[%s2501_s8 + $0x18] sm:$0xff] %v573_v25   ;;  %1833 = vmatmul.mubr.bf16.vlgmr.msra.gmra.mrb[4].mxu1 %v573_v25 }
 0x36e   :  { %1872 = vmatprep.mubr.msk.bf16.mxu1 %vm2055_vm0, %v2052_v15  ;;  %1857 = vmatpush3.bf16.msra.mxu1 %v1990_v32  ;;  %v2011_v32 = vld [vmem:[%s2498_s3 + $0x1e8] sm:$0xff]  }
 0x36f   :  { %1858 = vmatprep.subr.bf16.mxu1 %v2052_v15 }
 0x372   :  { %1859 = vmatpush3.bf16.msra.mxu1 %v1991_v33  ;;  %v2012_v33 = vld [vmem:[%s2498_s3 + $0x1f0] sm:$0xff]  }
 0x373   :  { %1860 = vmatprep.subr.bf16.mxu1 %v2052_v15 }
 0x376   :  { %1861 = vmatpush3.bf16.msra.mxu1 %v1992_v48 }
 0x377   :  { %1862 = vmatprep.subr.bf16.mxu1 %v2052_v15 }
 0x37a   :  { %1863 = vmatpush3.bf16.msra.mxu1 %v1993_v49 }
 0x37b   :  { %1864 = vmatprep.subr.bf16.mxu1 %v2052_v15 }
 0x37e   :  { %1865 = vmatpush3.bf16.msra.mxu1 %v1994_v50 }
 0x37f   :  { %1866 = vmatprep.subr.bf16.mxu1 %v2052_v15 }
 0x382   :  { %1867 = vmatpush3.bf16.msra.mxu1 %v1995_v51  ;;  %v2016_v51 = vld [vmem:[%s2503_s5 + $0x10] sm:$0xff]  }
 0x383   :  { %1868 = vmatprep.subr.bf16.mxu1 %v2052_v15 }
 0x386   :  { %1869 = vmatpush3.bf16.msra.mxu1 %v1996_v52  ;;  %v2017_v52 = vld [vmem:[%s2503_s5 + $0x18] sm:$0xff]  }
 0x387   :  { %1870 = vmatprep.subr.bf16.mxu1 %v2052_v15 }
 0x38a   :  { %1871 = vmatpush3.bf16.msra.mxu1 %v1997_v53  ;;  %v2018_v53 = vld [vmem:[%s2503_s5 + $0x20] sm:$0xff]  }
 0x38b   :  { %1896 = vmatprep.subr.bf16.mxu1 %v2052_v15 }
 0x440   :  { %v691_v35 = vpop.f32.mrb[4].mxu1 }
 0x441   :  { %v1834_v36 = vpop.f32.mrb[5].mxu1  ;;  %v692_v38 = vadd.f32 %v1462_v34, %v691_v35  ;;  %v2014_v35 = vld [vmem:[%s2503_s5] sm:$0xff]  }
 0x442   :  { %v694_v37 = vpop.f32.mrb[6].mxu1  ;;  %v2015_v36 = vld [vmem:[%s2503_s5 + $0x8] sm:$0xff]  }
 0x443   :  { %v695_v39 = vadd.f32 %v1462_v34, %v694_v37  ;;  %v1835_v40 = vpop.f32.mrb[7].mxu1  ;;  %v2013_v34 = vld [vmem:[%s2498_s3 + $0x1f8] sm:$0xff]   ;;  %v1552_v37 = vld [vmem:[%s2502_s4 + $0x6] ss:$0 sm:$0xff] }
 0x445   :  { %v698_v41 = vpack.c.bf16 %v695_v39, %v692_v38 }
 0x447   :  { %2040 = vtanh.bf16 %v698_v41 }
 0x452   :  { %v2041_v42 = vpop.eup %2040 }
 0x453   :  { %v700_v43 = vunpack.c.l.bf16 %v2041_v42  ;;  %v701_v44 = vunpack.c.h.bf16 %v2041_v42 }
 0x455   :  { %v702_v45 = vadd.f32 %v700_v43, %v571_v23  ;;  %v703_v46 = vadd.f32 %v701_v44, %v572_v24 }
 0x457   :  { %v704_v47 = vpack.c.bf16 %v703_v46, %v702_v45 }
 0x459   :  { %1670 = vst [vmem:[%s2501_s8 + $0x20] sm:$0xff] %v704_v47   ;;  %1853 = vmatmul.mubr.bf16.vlgmr.msra.gmra.mrb[8].mxu0 %v704_v47 }
 0x45a   :  { %1892 = vmatprep.mubr.msk.bf16.mxu0 %vm2055_vm0, %v2052_v15  ;;  %1877 = vmatpush3.bf16.msra.mxu0 %v1998_v54  ;;  %v2019_v54 = vld [vmem:[%s2503_s5 + $0x28] sm:$0xff]  }
 0x45b   :  { %1878 = vmatprep.subr.bf16.mxu0 %v2052_v15 }
 0x45e   :  { %1879 = vmatpush3.bf16.msra.mxu0 %v1999_v55  ;;  %v2020_v55 = vld [vmem:[%s2503_s5 + $0x30] sm:$0xff]  }
 0x45f   :  { %1880 = vmatprep.subr.bf16.mxu0 %v2052_v15 }
 0x462   :  { %1881 = vmatpush3.bf16.msra.mxu0 %v2000_v6 }
 0x463   :  { %1882 = vmatprep.subr.bf16.mxu0 %v2052_v15 }
 0x466   :  { %1883 = vmatpush3.bf16.msra.mxu0 %v2001_v7 }
 0x467   :  { %1884 = vmatprep.subr.bf16.mxu0 %v2052_v15 }
 0x46a   :  { %1885 = vmatpush3.bf16.msra.mxu0 %v2002_v8 }
 0x46b   :  { %1886 = vmatprep.subr.bf16.mxu0 %v2052_v15 }
 0x46e   :  { %1887 = vmatpush3.bf16.msra.mxu0 %v2003_v9 }
 0x46f   :  { %1888 = vmatprep.subr.bf16.mxu0 %v2052_v15 }
 0x472   :  { %1889 = vmatpush3.bf16.msra.mxu0 %v2004_v10 }
 0x473   :  { %1890 = vmatprep.subr.bf16.mxu0 %v2052_v15 }
 0x476   :  { %1891 = vmatpush3.bf16.msra.mxu0 %v2005_v11 }
 0x477   :  { %1916 = vmatprep.subr.bf16.mxu0 %v2052_v15 }
 0x52c   :  { %v822_v57 = vpop.f32.mrb[8].mxu0 }
 0x52d   :  { %v1854_v58 = vpop.f32.mrb[9].mxu0  ;;  %v823_v60 = vadd.f32 %v1492_v56, %v822_v57  ;;  %v1582_v57 = vld [vmem:[%s2502_s4 + $0x7] ss:$0 sm:$0xff] }
 0x52e   :  { %v825_v59 = vpop.f32.mrb[10].mxu0 }
 0x52f   :  { %v826_v61 = vadd.f32 %v1492_v56, %v825_v59  ;;  %v1855_v62 = vpop.f32.mrb[11].mxu0  ;;  %v2021_v56 = vld [vmem:[%s2503_s5 + $0x38] sm:$0xff]  }
 0x531   :  { %v829_v63 = vpack.c.bf16 %v826_v61, %v823_v60 }
 0x533   :  { %2042 = vtanh.bf16 %v829_v63 }
 0x53e   :  { %v2043_v0 = vpop.eup %2042 }
 0x53f   :  { %v831_v1 = vunpack.c.l.bf16 %v2043_v0  ;;  %v832_v2 = vunpack.c.h.bf16 %v2043_v0 }
 0x541   :  { %v833_v3 = vadd.f32 %v831_v1, %v702_v45  ;;  %v834_v4 = vadd.f32 %v832_v2, %v703_v46 }
 0x543   :  { %v835_v5 = vpack.c.bf16 %v834_v4, %v833_v3 }
 0x545   :  { %1671 = vst [vmem:[%s2501_s8 + $0x28] sm:$0xff] %v835_v5   ;;  %1873 = vmatmul.mubr.bf16.vlgmr.msra.gmra.mrb[8].mxu1 %v835_v5 }
 0x546   :  { %1912 = vmatprep.mubr.msk.bf16.mxu1 %vm2055_vm0, %v2052_v15  ;;  %1897 = vmatpush3.bf16.msra.mxu1 %v2006_v12 }
 0x547   :  { %1898 = vmatprep.subr.bf16.mxu1 %v2052_v15 }
 0x54a   :  { %1899 = vmatpush3.bf16.msra.mxu1 %v2007_v13 }
 0x54b   :  { %1900 = vmatprep.subr.bf16.mxu1 %v2052_v15 }
 0x54e   :  { %1901 = vmatpush3.bf16.msra.mxu1 %v2008_v29 }
 0x54f   :  { %1902 = vmatprep.subr.bf16.mxu1 %v2052_v15 }
 0x552   :  { %1903 = vmatpush3.bf16.msra.mxu1 %v2009_v30 }
 0x553   :  { %1904 = vmatprep.subr.bf16.mxu1 %v2052_v15 }
 0x556   :  { %1905 = vmatpush3.bf16.msra.mxu1 %v2010_v31 }
 0x557   :  { %1906 = vmatprep.subr.bf16.mxu1 %v2052_v15 }
 0x55a   :  { %1907 = vmatpush3.bf16.msra.mxu1 %v2011_v32 }
 0x55b   :  { %1908 = vmatprep.subr.bf16.mxu1 %v2052_v15 }
 0x55e   :  { %1909 = vmatpush3.bf16.msra.mxu1 %v2012_v33 }
 0x55f   :  { %1910 = vmatprep.subr.bf16.mxu1 %v2052_v15 }
 0x562   :  { %1911 = vmatpush3.bf16.msra.mxu1 %v2013_v34 }
 0x618   :  { %v953_v16 = vpop.f32.mrb[8].mxu1 }
 0x619   :  { %v1874_v17 = vpop.f32.mrb[9].mxu1  ;;  %v954_v19 = vadd.f32 %v1522_v14, %v953_v16 }
 0x61a   :  { %v956_v18 = vpop.f32.mrb[10].mxu1 }
 0x61b   :  { %v957_v20 = vadd.f32 %v1522_v14, %v956_v18  ;;  %v1875_v21 = vpop.f32.mrb[11].mxu1 }
 0x61d   :  { %v960_v22 = vpack.c.bf16 %v957_v20, %v954_v19 }
 0x61f   :  { %2044 = vtanh.bf16 %v960_v22 }
 0x62a   :  { %v2045_v23 = vpop.eup %2044 }
 0x62b   :  { %v962_v24 = vunpack.c.l.bf16 %v2045_v23  ;;  %v963_v25 = vunpack.c.h.bf16 %v2045_v23 }
 0x62d   :  { %v964_v26 = vadd.f32 %v962_v24, %v833_v3  ;;  %v965_v27 = vadd.f32 %v963_v25, %v834_v4 }
 0x62f   :  { %v966_v28 = vpack.c.bf16 %v965_v27, %v964_v26 }
 0x631   :  { %1672 = vst [vmem:[%s2501_s8 + $0x30] sm:$0xff] %v966_v28   ;;  %1893 = vmatmul.mubr.bf16.vlgmr.msra.gmra.mrb[12].mxu0 %v966_v28 }
 0x632   :  { %1932 = vmatprep.mubr.msk.bf16.mxu0 %vm2055_vm0, %v2052_v15  ;;  %1917 = vmatpush3.bf16.msra.mxu0 %v2014_v35 }
 0x633   :  { %1918 = vmatprep.subr.bf16.mxu0 %v2052_v15 }
 0x636   :  { %1919 = vmatpush3.bf16.msra.mxu0 %v2015_v36 }
 0x637   :  { %1920 = vmatprep.subr.bf16.mxu0 %v2052_v15 }
 0x63a   :  { %1921 = vmatpush3.bf16.msra.mxu0 %v2016_v51 }
 0x63b   :  { %1922 = vmatprep.subr.bf16.mxu0 %v2052_v15 }
 0x63e   :  { %1923 = vmatpush3.bf16.msra.mxu0 %v2017_v52 }
 0x63f   :  { %1924 = vmatprep.subr.bf16.mxu0 %v2052_v15 }
 0x642   :  { %1925 = vmatpush3.bf16.msra.mxu0 %v2018_v53 }
 0x643   :  { %1926 = vmatprep.subr.bf16.mxu0 %v2052_v15 }
 0x646   :  { %1927 = vmatpush3.bf16.msra.mxu0 %v2019_v54 }
 0x647   :  { %1928 = vmatprep.subr.bf16.mxu0 %v2052_v15 }
 0x64a   :  { %1929 = vmatpush3.bf16.msra.mxu0 %v2020_v55 }
 0x64b   :  { %1930 = vmatprep.subr.bf16.mxu0 %v2052_v15  ;;  %v1595_v15 = vld [vmem:[%s2504_s6] ss:$0 sm:$0xff] }
 0x64e   :  { %1931 = vmatpush3.bf16.msra.mxu0 %v2021_v56 }
 0x704   :  { %v1084_v38 = vpop.f32.mrb[12].mxu0 }
 0x705   :  { %v1894_v39 = vpop.f32.mrb[13].mxu0  ;;  %v1085_v41 = vadd.f32 %v1552_v37, %v1084_v38 }
 0x706   :  { %v1087_v40 = vpop.f32.mrb[14].mxu0 }
 0x707   :  { %v1088_v42 = vadd.f32 %v1552_v37, %v1087_v40  ;;  %v1895_v43 = vpop.f32.mrb[15].mxu0 }
 0x709   :  { %v1091_v44 = vpack.c.bf16 %v1088_v42, %v1085_v41 }
 0x70b   :  { %2046 = vtanh.bf16 %v1091_v44 }
 0x716   :  { %v2047_v45 = vpop.eup %2046 }
 0x717   :  { %v1093_v46 = vunpack.c.l.bf16 %v2047_v45  ;;  %v1094_v47 = vunpack.c.h.bf16 %v2047_v45 }
 0x719   :  { %v1095_v48 = vadd.f32 %v1093_v46, %v964_v26  ;;  %v1096_v49 = vadd.f32 %v1094_v47, %v965_v27 }
 0x71b   :  { %v1097_v50 = vpack.c.bf16 %v1096_v49, %v1095_v48 }
 0x71d   :  { %1673 = vst [vmem:[%s2501_s8 + $0x38] sm:$0xff] %v1097_v50   ;;  %1913 = vmatmul.mubr.bf16.vlgmr.msra.gmra.mrb[12].mxu1 %v1097_v50 }
 0x7f0   :  { %v1215_v58 = vpop.f32.mrb[12].mxu1 }
 0x7f1   :  { %v1914_v59 = vpop.f32.mrb[13].mxu1  ;;  %v1216_v61 = vadd.f32 %v1582_v57, %v1215_v58 }
 0x7f2   :  { %v1218_v60 = vpop.f32.mrb[14].mxu1 }
 0x7f3   :  { %v1219_v62 = vadd.f32 %v1582_v57, %v1218_v60  ;;  %v1915_v63 = vpop.f32.mrb[15].mxu1 }
 0x7f5   :  { %v1222_v0 = vpack.c.bf16 %v1219_v62, %v1216_v61 }
 0x7f7   :  { %2048 = vtanh.bf16 %v1222_v0 }
 0x802   :  { %v2049_v1 = vpop.eup %2048 }
 0x803   :  { %v1224_v2 = vunpack.c.l.bf16 %v2049_v1  ;;  %v1225_v3 = vunpack.c.h.bf16 %v2049_v1 }
 0x805   :  { %v1226_v4 = vadd.f32 %v1224_v2, %v1095_v48  ;;  %v1227_v5 = vadd.f32 %v1225_v3, %v1096_v49 }
 0x807   :  { %v1228_v6 = vpack.c.bf16 %v1227_v5, %v1226_v4 }
 0x809   :  { %1674 = vst [vmem:[%s2501_s8 + $0x40] sm:$0xff] %v1228_v6   ;;  %1933 = vmatmul.mubr.bf16.vlgmr.msra.gmra.mrb[16].mxu0 %v1228_v6 }
 0x8dc   :  { %v1344_v7 = vpop.f32.mrb[16].mxu0 }
 0x8dd   :  { %v1345_v8 = vadd.f32 %v1595_v15, %v1344_v7  ;;  %v1934_v9 = vpop.f32.mrb[17].mxu0 }
 0x8de   :  { %v1347_v10 = vpop.f32.mrb[18].mxu0 }
 0x8df   :  { %1352 = vst.msk [vmem:[%s2505_s7] sm:$0xff] %vm1351_vm1, %v1345_v8  ;;  %v1348_v11 = vadd.f32 %v1595_v15, %v1347_v10  ;;  %v1935_v12 = vpop.f32.mrb[19].mxu0 }
 0x8e1   :  { %1353 = vst.msk [vmem:[%s2505_s7 + $0x8] sm:$0xff] %vm1351_vm1, %v1348_v11 }

</bundles_post_ra>
